<compile_context>
chip_gen: v6e
topology: v6e:2x2x1
jax: 0.10.0
libtpu: 0.0.40
codegen_flags: <defaults>
</compile_context>

<pallas_src>
import functools

import jax
import jax.numpy as jnp
import numpy as np
from jax.experimental import pallas as pl
from jax.experimental.pallas import tpu as pltpu


def _round_up(x, m):
    return (x + m - 1) // m * m


def _dcgan_kernel(x_ref, pp_ref, wdw_ref, w1_ref, out_ref, slab_ref, *,
                  n_rows: int, ws: int, row0: int, span: int):
    """One batch block.

    x_ref:    (bb, Cin*n_rows, RW)  raw input; stride=2: row pairs [x[2r,:], x[2r+1,:]]
    pp_ref:   (RW, ws)              constant pool/pad matrix (row pair -> padded row)
    wdw_ref:  (Cp, 16)              depthwise 4x4 taps, Cin zero-padded to Cp sublanes
    w1_ref:   (Cout, Cp)            1x1 conv weights
    out_ref:  (bb, Cout, span)      lane-dense output slab (lane p = i*ws + j), span%128==0
    slab_ref: (Cp, slab_w)          VMEM scratch: zero-padded image, lane = r*ws + q
    """
    bb = x_ref.shape[0]
    cp = slab_ref.shape[0]
    cin = x_ref.shape[1] // n_rows

    pp = pp_ref[...]
    wdw = wdw_ref[...]
    w1 = w1_ref[...]

    # Pad rows / guard lanes / padded channels must read as zero; data lanes are
    # fully rewritten below for every batch element.
    slab_ref[...] = jnp.zeros_like(slab_ref)

    for bi in range(bb):
        # Fused avg-pool + left/right zero-pad: one small MXU matmul per element.
        x2 = x_ref[bi].astype(jnp.float32)                             # (Cin*n_rows, RW)
        pooled = jnp.dot(x2, pp, preferred_element_type=jnp.float32)   # (Cin*n_rows, ws)

        # Scatter padded rows into the per-channel flat slab (lane index r*ws + q).
        # TODO(synk): at large Cin*n_rows turn this static double loop into a
        # pl.loop / extra grid axis to avoid unrolled-code bloat.
        for c in range(cin):
            for r in range(n_rows):
                row = c * n_rows + r
                slab_ref[pl.ds(c, 1), pl.ds((row0 + r) * ws, ws)] = pooled[row:row + 1, :]

        xs = slab_ref[...]                                             # (Cp, slab_w)

        # Depthwise 4x4: 16 lane-shifted VPU FMAs -> (Cp, span) intermediate.
        dw = wdw[:, 0:1] * xs[:, 0:span]
        for k in range(1, 16):
            ki, kj = divmod(k, 4)
            d = ki * ws + kj
            dw = dw + wdw[:, k:k + 1] * xs[:, d:d + span]

        # 1x1 conv: a single (Cout, Cp) x (Cp, span) MXU matmul, stored lane-dense.
        out = jnp.dot(w1, dw, preferred_element_type=jnp.float32)
        out_ref[bi] = out.astype(out_ref.dtype)


def dcgan_fixed_layer(x, w_dw, w_1x1, stride=2):
    """x: (N, Cin, H, W); w_dw: (Cin, 1, 4, 4); w_1x1: (Cout, Cin, 1, 1)."""
    N, Cin, H, W = x.shape
    Cout = w_1x1.shape[0]

    if stride == 2:
        if H % 2 or W % 2:
            raise ValueError("stride=2 path requires even H and W")
        n_rows, rw = H // 2, 2 * W          # each presented row = two original rows
        Ho, Wo = H // 2, W // 2
        ws = Wo + 3                         # padded row width (left 1 + right 2)
        row0 = 1                            # one zero row on top
        # Pool/pad matrix: [x[2r,:], x[2r+1,:]] @ pp = 0.25*(2x2 sums) at columns 1..Wo.
        pp = np.zeros((rw, ws), np.float32)
        for j in range(Wo):
            for w2 in (2 * j, 2 * j + 1, W + 2 * j, W + 2 * j + 1):
                pp[w2, 1 + j] = 0.25
    elif stride == 1:
        n_rows, rw = H, W
        Ho, Wo = H - 3, W - 3
        ws = W                              # no padding, rows copied verbatim
        row0 = 0
        pp = np.eye(rw, ws, dtype=np.float32)
    else:
        raise RuntimeError("stride must be 1 or 2")

    if ws > 128:
        raise ValueError("padded row width must fit one 128-lane stripe")

    span = _round_up(Ho * ws, 128)              # lane-dense (unmasked-store) output width
    slab_w = _round_up(3 * ws + 3 + span, 128)  # covers every shifted tap window
    cp = _round_up(Cin, 8)                      # pad channels to full sublanes

    # Free contiguous reshape; x keeps its dtype through the DMA (bf16 stays bf16).
    xr = x.reshape(N, Cin * n_rows, rw)
    ppj = jnp.asarray(pp)
    wdw = jnp.zeros((cp, 16), jnp.float32).at[:Cin].set(
        w_dw.reshape(Cin, 16).astype(jnp.float32))
    w1 = jnp.zeros((Cout, cp), jnp.float32).at[:, :Cin].set(
        w_1x1.reshape(Cout, Cin).astype(jnp.float32))

    # Batch blocking: enough work per grid step, but keep >=2 parallel steps (v7x megacore).
    bb = 1
    for cand in range(1, N + 1):
        if N % cand:
            continue
        if N >= 2 and N // cand < 2:
            break
        bb = cand
        if cand * Cout * span >= 4096:
            break

    out_flat = pl.pallas_call(
        functools.partial(_dcgan_kernel, n_rows=n_rows, ws=ws, row0=row0, span=span),
        out_shape=jax.ShapeDtypeStruct((N, Cout, span), x.dtype),
        grid=(N // bb,),
        in_specs=[
            pl.BlockSpec((bb, Cin * n_rows, rw), lambda n: (n, 0, 0)),
            pl.BlockSpec((rw, ws), lambda n: (0, 0)),
            pl.BlockSpec((cp, 16), lambda n: (0, 0)),
            pl.BlockSpec((Cout, cp), lambda n: (0, 0)),
        ],
        out_specs=pl.BlockSpec((bb, Cout, span), lambda n: (n, 0, 0)),
        scratch_shapes=[pltpu.VMEM((cp, slab_w), jnp.float32)],
        compiler_params=pltpu.CompilerParams(
            dimension_semantics=("parallel",)),
    )(xr, ppj, wdw, w1)

    # Small layout plumbing back to NCHW (the padded slab could instead be fused
    # into the consumer). Output is already in x.dtype.
    out = out_flat[:, :, :Ho * ws].reshape(N, Cout, Ho, ws)[:, :, :, :Wo]
    return out


def _reference(x, w_dw, w_1x1, stride=2):
    """Pure-JAX reference matching the PyTorch module."""
    N, Cin, H, W = x.shape
    if stride == 2:
        pooled = jax.lax.reduce_window(
            x, 0.0, jax.lax.add, (1, 1, 2, 2), (1, 1, 2, 2), "VALID") / 4.0
        xpad = jnp.pad(pooled, ((0, 0), (0, 0), (1, 2), (1, 2)))
    else:
        xpad = x
    dw = jax.lax.conv_general_dilated(
        xpad, w_dw, (1, 1), "VALID",
        dimension_numbers=("NCHW", "OIHW", "NCHW"),
        feature_group_count=Cin)
    return jax.lax.conv_general_dilated(
        dw, w_1x1, (1, 1), "VALID",
        dimension_numbers=("NCHW", "OIHW", "NCHW"))


if __name__ == "__main__":
    key = jax.random.PRNGKey(0)
    kx, kdw, k1 = jax.random.split(key, 3)

    N, Cin, Cout, H, W = 2, 4, 8, 16, 16

    x = jax.random.normal(kx, (N, Cin, H, W), dtype=jnp.float32)
    # Fixed random depthwise weights (Cin, 1, 4, 4) — deterministic init in-script.
    w_dw = jax.random.normal(kdw, (Cin, 1, 4, 4), dtype=jnp.float32) * 0.1
    # Trainable-equivalent 1x1 conv weights (Cout, Cin, 1, 1).
    w_1x1 = jax.random.normal(k1, (Cout, Cin, 1, 1), dtype=jnp.float32) * 0.1

    # stride=2 (default DCGAN path)
    out2 = jax.block_until_ready(dcgan_fixed_layer(x, w_dw, w_1x1, stride=2))
    ref2 = jax.block_until_ready(_reference(x, w_dw, w_1x1, stride=2))
    assert out2.shape == (N, Cout, H // 2, W // 2), out2.shape
    assert jnp.allclose(out2, ref2, rtol=1e-4, atol=1e-4), \
        float(jnp.max(jnp.abs(out2 - ref2)))

    # stride=1 path (Identity pool/pad, 4x4 valid conv shrinks spatial dims by 3)
    out1 = jax.block_until_ready(dcgan_fixed_layer(x, w_dw, w_1x1, stride=1))
    ref1 = jax.block_until_ready(_reference(x, w_dw, w_1x1, stride=1))
    assert out1.shape == (N, Cout, H - 3, W - 3), out1.shape
    assert jnp.allclose(out1, ref1, rtol=1e-4, atol=1e-4), \
        float(jnp.max(jnp.abs(out1 - ref1)))

    print("KERNEL_OK")
</pallas_src>

<mosaic_0001>
module attributes {stable_mosaic.version = 11 : i64} {
  func.func @_dcgan_kernel(%arg0: i32, %arg1: memref<1x32x32xf32, #tpu.memory_space<vmem>>, %arg2: memref<32x11xf32, #tpu.memory_space<vmem>>, %arg3: memref<8x16xf32, #tpu.memory_space<vmem>>, %arg4: memref<8x8xf32, #tpu.memory_space<vmem>>, %arg5: memref<1x8x128xf32, #tpu.memory_space<vmem>>, %arg6: memref<8x256xf32, #tpu.memory_space<vmem>>) attributes {dimension_semantics = [#tpu.dimension_semantics<parallel>], iteration_bounds = array<i64: 2>, scalar_prefetch = 0 : i64, scratch_operands = 1 : i64, tpu.core_type = #tpu.core_type<tc>, window_params = [{transform_indices = @transform_0, window_bounds = array<i64: 1, 32, 32>}, {pipeline_mode = #tpu.pipeline_mode<synchronous>, transform_indices = @transform_1, window_bounds = array<i64: 32, 11>}, {pipeline_mode = #tpu.pipeline_mode<synchronous>, transform_indices = @transform_2, window_bounds = array<i64: 8, 16>}, {pipeline_mode = #tpu.pipeline_mode<synchronous>, transform_indices = @transform_3, window_bounds = array<i64: 8, 8>}, {transform_indices = @transform_4, window_bounds = array<i64: 1, 8, 128>}]} {
    %c0 = arith.constant 0 : index
    %c0_0 = arith.constant 0 : index
    %0 = vector.load %arg2[%c0, %c0_0] : memref<32x11xf32, #tpu.memory_space<vmem>>, vector<32x11xf32>
    %c0_1 = arith.constant 0 : index
    %c0_2 = arith.constant 0 : index
    %1 = vector.load %arg3[%c0_1, %c0_2] : memref<8x16xf32, #tpu.memory_space<vmem>>, vector<8x16xf32>
    %c0_3 = arith.constant 0 : index
    %c0_4 = arith.constant 0 : index
    %2 = vector.load %arg4[%c0_3, %c0_4] : memref<8x8xf32, #tpu.memory_space<vmem>>, vector<8x8xf32>
    %cst = arith.constant 0.000000e+00 : f32
    %3 = vector.broadcast %cst : f32 to vector<8x256xf32>
    %c0_5 = arith.constant 0 : index
    %c0_6 = arith.constant 0 : index
    %4 = vector.load %arg6[%c0_5, %c0_6] : memref<8x256xf32, #tpu.memory_space<vmem>>, vector<8x256xf32>
    tpu.vector_store %arg6[%c0_5, %c0_6], %3 {strides = array<i32>} : memref<8x256xf32, #tpu.memory_space<vmem>>, vector<8x256xf32>,
    %c0_7 = arith.constant 0 : index
    %c0_8 = arith.constant 0 : index
    %c0_9 = arith.constant 0 : index
    %5 = vector.load %arg1[%c0_7, %c0_8, %c0_9] : memref<1x32x32xf32, #tpu.memory_space<vmem>>, vector<1x32x32xf32>
    %6 = vector.shape_cast %5 : vector<1x32x32xf32> to vector<32x32xf32>
    %cst_10 = arith.constant dense<0.000000e+00> : vector<32x11xf32>
    %7 = tpu.matmul %6, %0, %cst_10 {dimension_numbers = #tpu.dot_dimension_numbers<[1], [0], [0], [1], [0, 0, 1, 1], [], []>} : vector<32x32xf32>, vector<32x11xf32>, vector<32x11xf32> -> vector<32x11xf32>
    %8 = vector.extract_strided_slice %7 {offsets = [0, 0], sizes = [1, 11], strides = [1, 1]} : vector<32x11xf32> to vector<1x11xf32>
    %c0_11 = arith.constant 0 : index
    %c11 = arith.constant 11 : index
    %9 = vector.load %arg6[%c0_11, %c11] : memref<8x256xf32, #tpu.memory_space<vmem>>, vector<1x11xf32>
    tpu.vector_store %arg6[%c0_11, %c11], %8 {strides = array<i32>} : memref<8x256xf32, #tpu.memory_space<vmem>>, vector<1x11xf32>,
    %10 = vector.extract_strided_slice %7 {offsets = [1, 0], sizes = [1, 11], strides = [1, 1]} : vector<32x11xf32> to vector<1x11xf32>
    %c0_12 = arith.constant 0 : index
    %c22 = arith.constant 22 : index
    %11 = vector.load %arg6[%c0_12, %c22] : memref<8x256xf32, #tpu.memory_space<vmem>>, vector<1x11xf32>
    tpu.vector_store %arg6[%c0_12, %c22], %10 {strides = array<i32>} : memref<8x256xf32, #tpu.memory_space<vmem>>, vector<1x11xf32>,
    %12 = vector.extract_strided_slice %7 {offsets = [2, 0], sizes = [1, 11], strides = [1, 1]} : vector<32x11xf32> to vector<1x11xf32>
    %c0_13 = arith.constant 0 : index
    %c33 = arith.constant 33 : index
    %13 = vector.load %arg6[%c0_13, %c33] : memref<8x256xf32, #tpu.memory_space<vmem>>, vector<1x11xf32>
    tpu.vector_store %arg6[%c0_13, %c33], %12 {strides = array<i32>} : memref<8x256xf32, #tpu.memory_space<vmem>>, vector<1x11xf32>,
    %14 = vector.extract_strided_slice %7 {offsets = [3, 0], sizes = [1, 11], strides = [1, 1]} : vector<32x11xf32> to vector<1x11xf32>
    %c0_14 = arith.constant 0 : index
    %c44 = arith.constant 44 : index
    %15 = vector.load %arg6[%c0_14, %c44] : memref<8x256xf32, #tpu.memory_space<vmem>>, vector<1x11xf32>
    tpu.vector_store %arg6[%c0_14, %c44], %14 {strides = array<i32>} : memref<8x256xf32, #tpu.memory_space<vmem>>, vector<1x11xf32>,
    %16 = vector.extract_strided_slice %7 {offsets = [4, 0], sizes = [1, 11], strides = [1, 1]} : vector<32x11xf32> to vector<1x11xf32>
    %c0_15 = arith.constant 0 : index
    %c55 = arith.constant 55 : index
    %17 = vector.load %arg6[%c0_15, %c55] : memref<8x256xf32, #tpu.memory_space<vmem>>, vector<1x11xf32>
    tpu.vector_store %arg6[%c0_15, %c55], %16 {strides = array<i32>} : memref<8x256xf32, #tpu.memory_space<vmem>>, vector<1x11xf32>,
    %18 = vector.extract_strided_slice %7 {offsets = [5, 0], sizes = [1, 11], strides = [1, 1]} : vector<32x11xf32> to vector<1x11xf32>
    %c0_16 = arith.constant 0 : index
    %c66 = arith.constant 66 : index
    %19 = vector.load %arg6[%c0_16, %c66] : memref<8x256xf32, #tpu.memory_space<vmem>>, vector<1x11xf32>
    tpu.vector_store %arg6[%c0_16, %c66], %18 {strides = array<i32>} : memref<8x256xf32, #tpu.memory_space<vmem>>, vector<1x11xf32>,
    %20 = vector.extract_strided_slice %7 {offsets = [6, 0], sizes = [1, 11], strides = [1, 1]} : vector<32x11xf32> to vector<1x11xf32>
    %c0_17 = arith.constant 0 : index
    %c77 = arith.constant 77 : index
    %21 = vector.load %arg6[%c0_17, %c77] : memref<8x256xf32, #tpu.memory_space<vmem>>, vector<1x11xf32>
    tpu.vector_store %arg6[%c0_17, %c77], %20 {strides = array<i32>} : memref<8x256xf32, #tpu.memory_space<vmem>>, vector<1x11xf32>,
    %22 = vector.extract_strided_slice %7 {offsets = [7, 0], sizes = [1, 11], strides = [1, 1]} : vector<32x11xf32> to vector<1x11xf32>
    %c0_18 = arith.constant 0 : index
    %c88 = arith.constant 88 : index
    %23 = vector.load %arg6[%c0_18, %c88] : memref<8x256xf32, #tpu.memory_space<vmem>>, vector<1x11xf32>
    tpu.vector_store %arg6[%c0_18, %c88], %22 {strides = array<i32>} : memref<8x256xf32, #tpu.memory_space<vmem>>, vector<1x11xf32>,
    %24 = vector.extract_strided_slice %7 {offsets = [8, 0], sizes = [1, 11], strides = [1, 1]} : vector<32x11xf32> to vector<1x11xf32>
    %c1 = arith.constant 1 : index
    %c11_19 = arith.constant 11 : index
    %25 = vector.load %arg6[%c1, %c11_19] : memref<8x256xf32, #tpu.memory_space<vmem>>, vector<1x11xf32>
    tpu.vector_store %arg6[%c1, %c11_19], %24 {strides = array<i32>} : memref<8x256xf32, #tpu.memory_space<vmem>>, vector<1x11xf32>,
    %26 = vector.extract_strided_slice %7 {offsets = [9, 0], sizes = [1, 11], strides = [1, 1]} : vector<32x11xf32> to vector<1x11xf32>
    %c1_20 = arith.constant 1 : index
    %c22_21 = arith.constant 22 : index
    %27 = vector.load %arg6[%c1_20, %c22_21] : memref<8x256xf32, #tpu.memory_space<vmem>>, vector<1x11xf32>
    tpu.vector_store %arg6[%c1_20, %c22_21], %26 {strides = array<i32>} : memref<8x256xf32, #tpu.memory_space<vmem>>, vector<1x11xf32>,
    %28 = vector.extract_strided_slice %7 {offsets = [10, 0], sizes = [1, 11], strides = [1, 1]} : vector<32x11xf32> to vector<1x11xf32>
    %c1_22 = arith.constant 1 : index
    %c33_23 = arith.constant 33 : index
    %29 = vector.load %arg6[%c1_22, %c33_23] : memref<8x256xf32, #tpu.memory_space<vmem>>, vector<1x11xf32>
    tpu.vector_store %arg6[%c1_22, %c33_23], %28 {strides = array<i32>} : memref<8x256xf32, #tpu.memory_space<vmem>>, vector<1x11xf32>,
    %30 = vector.extract_strided_slice %7 {offsets = [11, 0], sizes = [1, 11], strides = [1, 1]} : vector<32x11xf32> to vector<1x11xf32>
    %c1_24 = arith.constant 1 : index
    %c44_25 = arith.constant 44 : index
    %31 = vector.load %arg6[%c1_24, %c44_25] : memref<8x256xf32, #tpu.memory_space<vmem>>, vector<1x11xf32>
    tpu.vector_store %arg6[%c1_24, %c44_25], %30 {strides = array<i32>} : memref<8x256xf32, #tpu.memory_space<vmem>>, vector<1x11xf32>,
    %32 = vector.extract_strided_slice %7 {offsets = [12, 0], sizes = [1, 11], strides = [1, 1]} : vector<32x11xf32> to vector<1x11xf32>
    %c1_26 = arith.constant 1 : index
    %c55_27 = arith.constant 55 : index
    %33 = vector.load %arg6[%c1_26, %c55_27] : memref<8x256xf32, #tpu.memory_space<vmem>>, vector<1x11xf32>
    tpu.vector_store %arg6[%c1_26, %c55_27], %32 {strides = array<i32>} : memref<8x256xf32, #tpu.memory_space<vmem>>, vector<1x11xf32>,
    %34 = vector.extract_strided_slice %7 {offsets = [13, 0], sizes = [1, 11], strides = [1, 1]} : vector<32x11xf32> to vector<1x11xf32>
    %c1_28 = arith.constant 1 : index
    %c66_29 = arith.constant 66 : index
    %35 = vector.load %arg6[%c1_28, %c66_29] : memref<8x256xf32, #tpu.memory_space<vmem>>, vector<1x11xf32>
    tpu.vector_store %arg6[%c1_28, %c66_29], %34 {strides = array<i32>} : memref<8x256xf32, #tpu.memory_space<vmem>>, vector<1x11xf32>,
    %36 = vector.extract_strided_slice %7 {offsets = [14, 0], sizes = [1, 11], strides = [1, 1]} : vector<32x11xf32> to vector<1x11xf32>
    %c1_30 = arith.constant 1 : index
    %c77_31 = arith.constant 77 : index
    %37 = vector.load %arg6[%c1_30, %c77_31] : memref<8x256xf32, #tpu.memory_space<vmem>>, vector<1x11xf32>
    tpu.vector_store %arg6[%c1_30, %c77_31], %36 {strides = array<i32>} : memref<8x256xf32, #tpu.memory_space<vmem>>, vector<1x11xf32>,
    %38 = vector.extract_strided_slice %7 {offsets = [15, 0], sizes = [1, 11], strides = [1, 1]} : vector<32x11xf32> to vector<1x11xf32>
    %c1_32 = arith.constant 1 : index
    %c88_33 = arith.constant 88 : index
    %39 = vector.load %arg6[%c1_32, %c88_33] : memref<8x256xf32, #tpu.memory_space<vmem>>, vector<1x11xf32>
    tpu.vector_store %arg6[%c1_32, %c88_33], %38 {strides = array<i32>} : memref<8x256xf32, #tpu.memory_space<vmem>>, vector<1x11xf32>,
    %40 = vector.extract_strided_slice %7 {offsets = [16, 0], sizes = [1, 11], strides = [1, 1]} : vector<32x11xf32> to vector<1x11xf32>
    %c2 = arith.constant 2 : index
    %c11_34 = arith.constant 11 : index
    %41 = vector.load %arg6[%c2, %c11_34] : memref<8x256xf32, #tpu.memory_space<vmem>>, vector<1x11xf32>
    tpu.vector_store %arg6[%c2, %c11_34], %40 {strides = array<i32>} : memref<8x256xf32, #tpu.memory_space<vmem>>, vector<1x11xf32>,
    %42 = vector.extract_strided_slice %7 {offsets = [17, 0], sizes = [1, 11], strides = [1, 1]} : vector<32x11xf32> to vector<1x11xf32>
    %c2_35 = arith.constant 2 : index
    %c22_36 = arith.constant 22 : index
    %43 = vector.load %arg6[%c2_35, %c22_36] : memref<8x256xf32, #tpu.memory_space<vmem>>, vector<1x11xf32>
    tpu.vector_store %arg6[%c2_35, %c22_36], %42 {strides = array<i32>} : memref<8x256xf32, #tpu.memory_space<vmem>>, vector<1x11xf32>,
    %44 = vector.extract_strided_slice %7 {offsets = [18, 0], sizes = [1, 11], strides = [1, 1]} : vector<32x11xf32> to vector<1x11xf32>
    %c2_37 = arith.constant 2 : index
    %c33_38 = arith.constant 33 : index
    %45 = vector.load %arg6[%c2_37, %c33_38] : memref<8x256xf32, #tpu.memory_space<vmem>>, vector<1x11xf32>
    tpu.vector_store %arg6[%c2_37, %c33_38], %44 {strides = array<i32>} : memref<8x256xf32, #tpu.memory_space<vmem>>, vector<1x11xf32>,
    %46 = vector.extract_strided_slice %7 {offsets = [19, 0], sizes = [1, 11], strides = [1, 1]} : vector<32x11xf32> to vector<1x11xf32>
    %c2_39 = arith.constant 2 : index
    %c44_40 = arith.constant 44 : index
    %47 = vector.load %arg6[%c2_39, %c44_40] : memref<8x256xf32, #tpu.memory_space<vmem>>, vector<1x11xf32>
    tpu.vector_store %arg6[%c2_39, %c44_40], %46 {strides = array<i32>} : memref<8x256xf32, #tpu.memory_space<vmem>>, vector<1x11xf32>,
    %48 = vector.extract_strided_slice %7 {offsets = [20, 0], sizes = [1, 11], strides = [1, 1]} : vector<32x11xf32> to vector<1x11xf32>
    %c2_41 = arith.constant 2 : index
    %c55_42 = arith.constant 55 : index
    %49 = vector.load %arg6[%c2_41, %c55_42] : memref<8x256xf32, #tpu.memory_space<vmem>>, vector<1x11xf32>
    tpu.vector_store %arg6[%c2_41, %c55_42], %48 {strides = array<i32>} : memref<8x256xf32, #tpu.memory_space<vmem>>, vector<1x11xf32>,
    %50 = vector.extract_strided_slice %7 {offsets = [21, 0], sizes = [1, 11], strides = [1, 1]} : vector<32x11xf32> to vector<1x11xf32>
    %c2_43 = arith.constant 2 : index
    %c66_44 = arith.constant 66 : index
    %51 = vector.load %arg6[%c2_43, %c66_44] : memref<8x256xf32, #tpu.memory_space<vmem>>, vector<1x11xf32>
    tpu.vector_store %arg6[%c2_43, %c66_44], %50 {strides = array<i32>} : memref<8x256xf32, #tpu.memory_space<vmem>>, vector<1x11xf32>,
    %52 = vector.extract_strided_slice %7 {offsets = [22, 0], sizes = [1, 11], strides = [1, 1]} : vector<32x11xf32> to vector<1x11xf32>
    %c2_45 = arith.constant 2 : index
    %c77_46 = arith.constant 77 : index
    %53 = vector.load %arg6[%c2_45, %c77_46] : memref<8x256xf32, #tpu.memory_space<vmem>>, vector<1x11xf32>
    tpu.vector_store %arg6[%c2_45, %c77_46], %52 {strides = array<i32>} : memref<8x256xf32, #tpu.memory_space<vmem>>, vector<1x11xf32>,
    %54 = vector.extract_strided_slice %7 {offsets = [23, 0], sizes = [1, 11], strides = [1, 1]} : vector<32x11xf32> to vector<1x11xf32>
    %c2_47 = arith.constant 2 : index
    %c88_48 = arith.constant 88 : index
    %55 = vector.load %arg6[%c2_47, %c88_48] : memref<8x256xf32, #tpu.memory_space<vmem>>, vector<1x11xf32>
    tpu.vector_store %arg6[%c2_47, %c88_48], %54 {strides = array<i32>} : memref<8x256xf32, #tpu.memory_space<vmem>>, vector<1x11xf32>,
    %56 = vector.extract_strided_slice %7 {offsets = [24, 0], sizes = [1, 11], strides = [1, 1]} : vector<32x11xf32> to vector<1x11xf32>
    %c3 = arith.constant 3 : index
    %c11_49 = arith.constant 11 : index
    %57 = vector.load %arg6[%c3, %c11_49] : memref<8x256xf32, #tpu.memory_space<vmem>>, vector<1x11xf32>
    tpu.vector_store %arg6[%c3, %c11_49], %56 {strides = array<i32>} : memref<8x256xf32, #tpu.memory_space<vmem>>, vector<1x11xf32>,
    %58 = vector.extract_strided_slice %7 {offsets = [25, 0], sizes = [1, 11], strides = [1, 1]} : vector<32x11xf32> to vector<1x11xf32>
    %c3_50 = arith.constant 3 : index
    %c22_51 = arith.constant 22 : index
    %59 = vector.load %arg6[%c3_50, %c22_51] : memref<8x256xf32, #tpu.memory_space<vmem>>, vector<1x11xf32>
    tpu.vector_store %arg6[%c3_50, %c22_51], %58 {strides = array<i32>} : memref<8x256xf32, #tpu.memory_space<vmem>>, vector<1x11xf32>,
    %60 = vector.extract_strided_slice %7 {offsets = [26, 0], sizes = [1, 11], strides = [1, 1]} : vector<32x11xf32> to vector<1x11xf32>
    %c3_52 = arith.constant 3 : index
    %c33_53 = arith.constant 33 : index
    %61 = vector.load %arg6[%c3_52, %c33_53] : memref<8x256xf32, #tpu.memory_space<vmem>>, vector<1x11xf32>
    tpu.vector_store %arg6[%c3_52, %c33_53], %60 {strides = array<i32>} : memref<8x256xf32, #tpu.memory_space<vmem>>, vector<1x11xf32>,
    %62 = vector.extract_strided_slice %7 {offsets = [27, 0], sizes = [1, 11], strides = [1, 1]} : vector<32x11xf32> to vector<1x11xf32>
    %c3_54 = arith.constant 3 : index
    %c44_55 = arith.constant 44 : index
    %63 = vector.load %arg6[%c3_54, %c44_55] : memref<8x256xf32, #tpu.memory_space<vmem>>, vector<1x11xf32>
    tpu.vector_store %arg6[%c3_54, %c44_55], %62 {strides = array<i32>} : memref<8x256xf32, #tpu.memory_space<vmem>>, vector<1x11xf32>,
    %64 = vector.extract_strided_slice %7 {offsets = [28, 0], sizes = [1, 11], strides = [1, 1]} : vector<32x11xf32> to vector<1x11xf32>
    %c3_56 = arith.constant 3 : index
    %c55_57 = arith.constant 55 : index
    %65 = vector.load %arg6[%c3_56, %c55_57] : memref<8x256xf32, #tpu.memory_space<vmem>>, vector<1x11xf32>
    tpu.vector_store %arg6[%c3_56, %c55_57], %64 {strides = array<i32>} : memref<8x256xf32, #tpu.memory_space<vmem>>, vector<1x11xf32>,
    %66 = vector.extract_strided_slice %7 {offsets = [29, 0], sizes = [1, 11], strides = [1, 1]} : vector<32x11xf32> to vector<1x11xf32>
    %c3_58 = arith.constant 3 : index
    %c66_59 = arith.constant 66 : index
    %67 = vector.load %arg6[%c3_58, %c66_59] : memref<8x256xf32, #tpu.memory_space<vmem>>, vector<1x11xf32>
    tpu.vector_store %arg6[%c3_58, %c66_59], %66 {strides = array<i32>} : memref<8x256xf32, #tpu.memory_space<vmem>>, vector<1x11xf32>,
    %68 = vector.extract_strided_slice %7 {offsets = [30, 0], sizes = [1, 11], strides = [1, 1]} : vector<32x11xf32> to vector<1x11xf32>
    %c3_60 = arith.constant 3 : index
    %c77_61 = arith.constant 77 : index
    %69 = vector.load %arg6[%c3_60, %c77_61] : memref<8x256xf32, #tpu.memory_space<vmem>>, vector<1x11xf32>
    tpu.vector_store %arg6[%c3_60, %c77_61], %68 {strides = array<i32>} : memref<8x256xf32, #tpu.memory_space<vmem>>, vector<1x11xf32>,
    %70 = vector.extract_strided_slice %7 {offsets = [31, 0], sizes = [1, 11], strides = [1, 1]} : vector<32x11xf32> to vector<1x11xf32>
    %c3_62 = arith.constant 3 : index
    %c88_63 = arith.constant 88 : index
    %71 = vector.load %arg6[%c3_62, %c88_63] : memref<8x256xf32, #tpu.memory_space<vmem>>, vector<1x11xf32>
    tpu.vector_store %arg6[%c3_62, %c88_63], %70 {strides = array<i32>} : memref<8x256xf32, #tpu.memory_space<vmem>>, vector<1x11xf32>,
    %c0_64 = arith.constant 0 : index
    %c0_65 = arith.constant 0 : index
    %72 = vector.load %arg6[%c0_64, %c0_65] : memref<8x256xf32, #tpu.memory_space<vmem>>, vector<8x256xf32>
    %73 = vector.extract_strided_slice %1 {offsets = [0, 0], sizes = [8, 1], strides = [1, 1]} : vector<8x16xf32> to vector<8x1xf32>
    %74 = vector.extract_strided_slice %72 {offsets = [0, 0], sizes = [8, 128], strides = [1, 1]} : vector<8x256xf32> to vector<8x128xf32>
    %75 = vector.broadcast %73 : vector<8x1xf32> to vector<8x128xf32>
    %76 = arith.mulf %75, %74 : vector<8x128xf32>
    %77 = vector.extract_strided_slice %1 {offsets = [0, 1], sizes = [8, 1], strides = [1, 1]} : vector<8x16xf32> to vector<8x1xf32>
    %78 = vector.extract_strided_slice %72 {offsets = [0, 1], sizes = [8, 128], strides = [1, 1]} : vector<8x256xf32> to vector<8x128xf32>
    %79 = vector.broadcast %77 : vector<8x1xf32> to vector<8x128xf32>
    %80 = arith.mulf %79, %78 : vector<8x128xf32>
    %81 = arith.addf %76, %80 : vector<8x128xf32>
    %82 = vector.extract_strided_slice %1 {offsets = [0, 2], sizes = [8, 1], strides = [1, 1]} : vector<8x16xf32> to vector<8x1xf32>
    %83 = vector.extract_strided_slice %72 {offsets = [0, 2], sizes = [8, 128], strides = [1, 1]} : vector<8x256xf32> to vector<8x128xf32>
    %84 = vector.broadcast %82 : vector<8x1xf32> to vector<8x128xf32>
    %85 = arith.mulf %84, %83 : vector<8x128xf32>
    %86 = arith.addf %81, %85 : vector<8x128xf32>
    %87 = vector.extract_strided_slice %1 {offsets = [0, 3], sizes = [8, 1], strides = [1, 1]} : vector<8x16xf32> to vector<8x1xf32>
    %88 = vector.extract_strided_slice %72 {offsets = [0, 3], sizes = [8, 128], strides = [1, 1]} : vector<8x256xf32> to vector<8x128xf32>
    %89 = vector.broadcast %87 : vector<8x1xf32> to vector<8x128xf32>
    %90 = arith.mulf %89, %88 : vector<8x128xf32>
    %91 = arith.addf %86, %90 : vector<8x128xf32>
    %92 = vector.extract_strided_slice %1 {offsets = [0, 4], sizes = [8, 1], strides = [1, 1]} : vector<8x16xf32> to vector<8x1xf32>
    %93 = vector.extract_strided_slice %72 {offsets = [0, 11], sizes = [8, 128], strides = [1, 1]} : vector<8x256xf32> to vector<8x128xf32>
    %94 = vector.broadcast %92 : vector<8x1xf32> to vector<8x128xf32>
    %95 = arith.mulf %94, %93 : vector<8x128xf32>
    %96 = arith.addf %91, %95 : vector<8x128xf32>
    %97 = vector.extract_strided_slice %1 {offsets = [0, 5], sizes = [8, 1], strides = [1, 1]} : vector<8x16xf32> to vector<8x1xf32>
    %98 = vector.extract_strided_slice %72 {offsets = [0, 12], sizes = [8, 128], strides = [1, 1]} : vector<8x256xf32> to vector<8x128xf32>
    %99 = vector.broadcast %97 : vector<8x1xf32> to vector<8x128xf32>
    %100 = arith.mulf %99, %98 : vector<8x128xf32>
    %101 = arith.addf %96, %100 : vector<8x128xf32>
    %102 = vector.extract_strided_slice %1 {offsets = [0, 6], sizes = [8, 1], strides = [1, 1]} : vector<8x16xf32> to vector<8x1xf32>
    %103 = vector.extract_strided_slice %72 {offsets = [0, 13], sizes = [8, 128], strides = [1, 1]} : vector<8x256xf32> to vector<8x128xf32>
    %104 = vector.broadcast %102 : vector<8x1xf32> to vector<8x128xf32>
    %105 = arith.mulf %104, %103 : vector<8x128xf32>
    %106 = arith.addf %101, %105 : vector<8x128xf32>
    %107 = vector.extract_strided_slice %1 {offsets = [0, 7], sizes = [8, 1], strides = [1, 1]} : vector<8x16xf32> to vector<8x1xf32>
    %108 = vector.extract_strided_slice %72 {offsets = [0, 14], sizes = [8, 128], strides = [1, 1]} : vector<8x256xf32> to vector<8x128xf32>
    %109 = vector.broadcast %107 : vector<8x1xf32> to vector<8x128xf32>
    %110 = arith.mulf %109, %108 : vector<8x128xf32>
    %111 = arith.addf %106, %110 : vector<8x128xf32>
    %112 = vector.extract_strided_slice %1 {offsets = [0, 8], sizes = [8, 1], strides = [1, 1]} : vector<8x16xf32> to vector<8x1xf32>
    %113 = vector.extract_strided_slice %72 {offsets = [0, 22], sizes = [8, 128], strides = [1, 1]} : vector<8x256xf32> to vector<8x128xf32>
    %114 = vector.broadcast %112 : vector<8x1xf32> to vector<8x128xf32>
    %115 = arith.mulf %114, %113 : vector<8x128xf32>
    %116 = arith.addf %111, %115 : vector<8x128xf32>
    %117 = vector.extract_strided_slice %1 {offsets = [0, 9], sizes = [8, 1], strides = [1, 1]} : vector<8x16xf32> to vector<8x1xf32>
    %118 = vector.extract_strided_slice %72 {offsets = [0, 23], sizes = [8, 128], strides = [1, 1]} : vector<8x256xf32> to vector<8x128xf32>
    %119 = vector.broadcast %117 : vector<8x1xf32> to vector<8x128xf32>
    %120 = arith.mulf %119, %118 : vector<8x128xf32>
    %121 = arith.addf %116, %120 : vector<8x128xf32>
    %122 = vector.extract_strided_slice %1 {offsets = [0, 10], sizes = [8, 1], strides = [1, 1]} : vector<8x16xf32> to vector<8x1xf32>
    %123 = vector.extract_strided_slice %72 {offsets = [0, 24], sizes = [8, 128], strides = [1, 1]} : vector<8x256xf32> to vector<8x128xf32>
    %124 = vector.broadcast %122 : vector<8x1xf32> to vector<8x128xf32>
    %125 = arith.mulf %124, %123 : vector<8x128xf32>
    %126 = arith.addf %121, %125 : vector<8x128xf32>
    %127 = vector.extract_strided_slice %1 {offsets = [0, 11], sizes = [8, 1], strides = [1, 1]} : vector<8x16xf32> to vector<8x1xf32>
    %128 = vector.extract_strided_slice %72 {offsets = [0, 25], sizes = [8, 128], strides = [1, 1]} : vector<8x256xf32> to vector<8x128xf32>
    %129 = vector.broadcast %127 : vector<8x1xf32> to vector<8x128xf32>
    %130 = arith.mulf %129, %128 : vector<8x128xf32>
    %131 = arith.addf %126, %130 : vector<8x128xf32>
    %132 = vector.extract_strided_slice %1 {offsets = [0, 12], sizes = [8, 1], strides = [1, 1]} : vector<8x16xf32> to vector<8x1xf32>
    %133 = vector.extract_strided_slice %72 {offsets = [0, 33], sizes = [8, 128], strides = [1, 1]} : vector<8x256xf32> to vector<8x128xf32>
    %134 = vector.broadcast %132 : vector<8x1xf32> to vector<8x128xf32>
    %135 = arith.mulf %134, %133 : vector<8x128xf32>
    %136 = arith.addf %131, %135 : vector<8x128xf32>
    %137 = vector.extract_strided_slice %1 {offsets = [0, 13], sizes = [8, 1], strides = [1, 1]} : vector<8x16xf32> to vector<8x1xf32>
    %138 = vector.extract_strided_slice %72 {offsets = [0, 34], sizes = [8, 128], strides = [1, 1]} : vector<8x256xf32> to vector<8x128xf32>
    %139 = vector.broadcast %137 : vector<8x1xf32> to vector<8x128xf32>
    %140 = arith.mulf %139, %138 : vector<8x128xf32>
    %141 = arith.addf %136, %140 : vector<8x128xf32>
    %142 = vector.extract_strided_slice %1 {offsets = [0, 14], sizes = [8, 1], strides = [1, 1]} : vector<8x16xf32> to vector<8x1xf32>
    %143 = vector.extract_strided_slice %72 {offsets = [0, 35], sizes = [8, 128], strides = [1, 1]} : vector<8x256xf32> to vector<8x128xf32>
    %144 = vector.broadcast %142 : vector<8x1xf32> to vector<8x128xf32>
    %145 = arith.mulf %144, %143 : vector<8x128xf32>
    %146 = arith.addf %141, %145 : vector<8x128xf32>
    %147 = vector.extract_strided_slice %1 {offsets = [0, 15], sizes = [8, 1], strides = [1, 1]} : vector<8x16xf32> to vector<8x1xf32>
    %148 = vector.extract_strided_slice %72 {offsets = [0, 36], sizes = [8, 128], strides = [1, 1]} : vector<8x256xf32> to vector<8x128xf32>
    %149 = vector.broadcast %147 : vector<8x1xf32> to vector<8x128xf32>
    %150 = arith.mulf %149, %148 : vector<8x128xf32>
    %151 = arith.addf %146, %150 : vector<8x128xf32>
    %cst_66 = arith.constant dense<0.000000e+00> : vector<8x128xf32>
    %152 = tpu.matmul %2, %151, %cst_66 {dimension_numbers = #tpu.dot_dimension_numbers<[1], [0], [0], [1], [0, 0, 1, 1], [], []>} : vector<8x8xf32>, vector<8x128xf32>, vector<8x128xf32> -> vector<8x128xf32>
    %c0_67 = arith.constant 0 : index
    %c0_68 = arith.constant 0 : index
    %c0_69 = arith.constant 0 : index
    %153 = vector.load %arg5[%c0_67, %c0_68, %c0_69] : memref<1x8x128xf32, #tpu.memory_space<vmem>>, vector<1x8x128xf32>
    %154 = vector.shape_cast %153 : vector<1x8x128xf32> to vector<8x128xf32>
    %155 = vector.shape_cast %152 : vector<8x128xf32> to vector<1x8x128xf32>
    tpu.vector_store %arg5[%c0_67, %c0_68, %c0_69], %155 {strides = array<i32>} : memref<1x8x128xf32, #tpu.memory_space<vmem>>, vector<1x8x128xf32>,
    return
  }
  func.func @transform_0(%arg0: i32) -> (i32, i32, i32) {
    %c0_i32 = arith.constant 0 : i32
    %c0_i32_0 = arith.constant 0 : i32
    %c0_i32_1 = arith.constant 0 : i32
    return %arg0, %c0_i32, %c0_i32_0 : i32, i32, i32
  }
  func.func @transform_1(%arg0: i32) -> (i32, i32) {
    %c0_i32 = arith.constant 0 : i32
    %c0_i32_0 = arith.constant 0 : i32
    %c0_i32_1 = arith.constant 0 : i32
    return %c0_i32, %c0_i32_0 : i32, i32
  }
  func.func @transform_2(%arg0: i32) -> (i32, i32) {
    %c0_i32 = arith.constant 0 : i32
    %c0_i32_0 = arith.constant 0 : i32
    %c0_i32_1 = arith.constant 0 : i32
    return %c0_i32, %c0_i32_0 : i32, i32
  }
  func.func @transform_3(%arg0: i32) -> (i32, i32) {
    %c0_i32 = arith.constant 0 : i32
    %c0_i32_0 = arith.constant 0 : i32
    %c0_i32_1 = arith.constant 0 : i32
    return %c0_i32, %c0_i32_0 : i32, i32
  }
  func.func @transform_4(%arg0: i32) -> (i32, i32, i32) {
    %c0_i32 = arith.constant 0 : i32
    %c0_i32_0 = arith.constant 0 : i32
    %c0_i32_1 = arith.constant 0 : i32
    return %arg0, %c0_i32, %c0_i32_0 : i32, i32, i32
  }
}

</mosaic_0001>

<bundles_post_ra>
// kernel: tpu_custom_call.1
= control target key start
LH: loop header
LB: loop body
LE: loop exit
PB: predicated region body
PF: predicated region fallthrough
CT: control target
= control target key end

     0   :  { %9 = vsyncpa [#allocation4], 0  ;;  %s1521_s0 = inlined_call_operand.hbm [shape: f32[2,32,32], index: 0, kind: input, shape index: {}]   ;;  %s1522_s1 = inlined_call_operand.vmem [shape: f32[32,11], index: 1, kind: input, shape index: {}]   ;;  %s1523_s2 = inlined_call_operand.vmem [shape: f32[8,16], index: 2, kind: input, shape index: {}]   ;;  %s1524_s3 = inlined_call_operand.vmem [shape: f32[8,8], index: 3, kind: input, shape index: {}]   ;;  %s1525_s4 = inlined_call_operand.hbm [shape: f32[2,8,128], index: 4, kind: output, shape index: {}]  }
   0x1   :  { %11 = vsyncpa [#allocation4 + $0x1], 0 }
   0x2   :  { %12 = vsyncpa [#allocation5], 0 }
   0x3   :  { %14 = vsyncpa [#allocation5 + $0x1], 0  ;;  %s1219_s15 = smov 0   ;;  %s1221_s16 = smov 0  }
   0x4   :  { %s1223_s17 = smov 0   ;;  %s1225_s18 = smov 0  }
   0x5 LB: > { %s1240_s19 = sadd.s32 4294967295, %s1147_s18   ;;  %s901_s20 = sadd.s32 4294967294, %s1147_s18   ;;  %s1147_s18 = sphi %s1225_s18, %s1540_s18   ;;  %s1143_s17 = sphi %s1223_s17, %s1539_s17   ;;  %s1139_s16 = sphi %s1221_s16, %s1538_s16   ;;  %s1135_s15 = sphi %s1219_s15, %s1537_s15  }
   0x6   : > { %s1244_s21 = sadd.s32 1, %s1147_s18   ;;  %s27_s22 = sadd.s32 1, %s1143_s17 }
   0x7   : > { %s24_s23 = ssub.s32 %s1147_s18, %s1244_s21  ;;  %p34_p0 = scmp.ne.s32.totalorder %s1143_s17, %s1139_s16 }
   0x8   : > { %p25_p1 = scmp.eq.s32.totalorder %s24_s23, 0  ;;  %p35_p2 = scmp.eq.s32.totalorder %s1147_s18, 0 }
   0x9   : > { %p40_p3 = scmp.ne.s32.totalorder %s1139_s16, %s1135_s15  ;;  %p41_p4 = scmp.eq.s32.totalorder %s1240_s19, 0 }
   0xa   : > { %s1256_s24 = scalar_select %p25_p1, %s1143_s17, %s27_s22  }
   0xb   : > { %p1258_p5 = por %p35_p2, %p34_p0  ;;  %p1262_p6 = por %p41_p4, %p40_p3 }
   0xc   : > { %p127_p7 = scmp.eq.s32.totalorder %s1240_s19, 1  ;;  %p133_p8 = scmp.eq.s32.totalorder %s901_s20, 1 }
   0xd   : > { %s1529_s26 = scalar_select %p1262_p6, 1, 0 }
   0xe   : > { %p961_p10 = scmp.lt.s32.totalorder %s1147_s18, 2  ;;  %p1269_p11 = por %p127_p7, %p34_p0 }
   0xf   : > { %p1273_p12 = por %p133_p8, %p40_p3  ;;  %s162_s29 = sand.u32 1, %s1143_s17  }
  0x10   : > { %s1530_s27 = scalar_select %p1269_p11, 1, 0 }
  0x11   : > { %s1531_s28 = scalar_select %p1273_p12, 1, 0 }
  0x12   : > { %s919_s30 = sshll.u32 %s1147_s18, 9  ;;  %s904_s5 = sshll.u32 %s162_s29, 5 }
  0x13   : > { %s1282_s8 = scalar_lea.hbm %s1521_s0, %s919_s30  ;;  %s166_s9 = scalar_lea.vmem [#allocation3], %s904_s5 }
  0x14   : > { %s173_s10 = sshll.u32 %s166_s9, 4  ;;  %p1286_p13 = pnand %p961_p10, %p1258_p5  ;;  %s1290_s10 = int_to_ptr.vmem [resolvable:$true] %s173_s10 }
  0x15   : > { %s1292_s12 = scalar_lea.sflag [#allocation4], %s162_s29  ;;  %s1055_s13 = scalar_lea.hbm %s1282_s8, 512 }
  0x16   : > { %p1056_p0 = scmp.ne.s32.totalorder %s1282_s8, %s1055_s13  ;;  %p1057_p1 = pneg %p1286_p13 }
  0x17   : > { %s1060_s22 = scalar_lea.hbm %s1521_s0, 1024  ;;  %p1061_p4 = scmp.lt.s32.totalorder %s1282_s8, %s1521_s0 }
  0x18   : > { %p1058_p2 = pnand %p1057_p1, %p1056_p0  ;;  %p1062_p5 = scmp.lt.s32.totalorder %s1060_s22, %s1055_s13 }
  0x1a   : > { %p1059_p3 = pneg %p1058_p2  ;;  %p1063_p7 = por %p1062_p5, %p1061_p4 }
  0x1c   : > { %p1064_p8 = pnand %p1063_p7, %p1059_p3 }
  0x1e   : > { %1067 = shalt.err (!%p1064_p8)
}
  0x1f   : > { %s1068_s29 = scalar_lea.vmem %s1290_s10, 512  ;;  %s1149_s30 = smov [#allocation3]  }
  0x20   : > { %p1069_p10 = scmp.ne.s32.totalorder %s1290_s10, %s1068_s29  ;;  %s1073_s5 = sshll.u32 %s1149_s30, 4  ;;  %s1074_s5 = int_to_ptr.vmem [resolvable:$false] %s1073_s5 }
  0x21   : > { %s1075_s6 = scalar_lea.vmem %s1074_s5, 1024  ;;  %p1076_p2 = scmp.lt.s32.totalorder %s1290_s10, %s1074_s5 }
  0x22   : > { %p1071_p9 = pnand %p1069_p10, %p1057_p1  ;;  %p1077_p12 = scmp.lt.s32.totalorder %s1075_s6, %s1068_s29 }
  0x24   : > { %p1072_p0 = pneg %p1071_p9  ;;  %p1078_p11 = por %p1077_p12, %p1076_p2 }
  0x26   : > { %p1079_p6 = pnand %p1078_p11, %p1072_p0 }
  0x28   : > { %1082 = shalt.err (!%p1079_p6)
}
  0x29   : > { %s1150_s7 = smov 128   ;;  %s1151_s9 = smov 8  }
  0x2a   : > { %956 = dma.hbm_to_vmem [thread:$0]  (!%p1286_p13), %s1282_s8, 512, %s1290_s10, %s1292_s12, %s1150_s7, %s1150_s7, %s1151_s9  }
  0x2b   : > { %p907_p9 = scmp.ge.s32.totalorder %s1147_s18, 1  ;;  %p181_p1 = scmp.lt.s32.totalorder %s1147_s18, 3 }
  0x2d   : > { %p182_p3 = pnand %p907_p9, %p181_p1 }
  0x2e   : > { %s1316_s13 = sand.u32 (!%p182_p3), 1, %s1139_s16   ;;  %p1533_p6 = scmp.ne.s32.totalorder (!%p182_p3), %s1529_s26, 0 }
  0x2f   : > { %185 = sbr.rel (%p182_p3) target bundleno = 821 (0x335), region = 36  ;;  %s908_s14 = sshll.u32 (!%p182_p3), %s1316_s13, 5 }
  0x30   : > { %s188_s20 = scalar_lea.sflag (!%p182_p3), [#allocation4], %s1316_s13  ;;  %s1320_s22 = scalar_lea.vmem (!%p182_p3), [#allocation3], %s908_s14 }
  0x34   : > { %1126 = dma.done.wait (%p1533_p6), %s188_s20, 512  }
  0x35   : > { %1128 = vsyncadd (%p1533_p6), %s188_s20, 4294966784  ;;  %v1152_v0 = vmov 1   ;;  %v1153_v1 = vmov 2   ;;  %vm228_vm0 = vcmask 261120   ;;  %v219_v2 = vld [vmem:[%s1522_s1 + $0x18] sm:$0xff]  ;;  %v218_v3 = vld [vmem:[%s1522_s1 + $0x10] sm:$0xff] }
  0x36   : > { %1038 = vset.pattern.permute.xlu0 %v1152_v0  ;;  %1039 = vset.pattern.permute.xlu1 %v1153_v1  ;;  %v224_v4 = vld [vmem:[%s1320_s22] sm:$0xff]  ;;  %v217_v5 = vld [vmem:[%s1522_s1 + $0x8] sm:$0xff]  ;;  %v1340_v6 = vld [vmem:[%s1523_s2] sm:$0xff]  ;;  %v1154_v10 = vmov 3   ;;  %v1155_v12 = vmov 4   ;;  %v1156_v13 = vmov 5  }
  0x37   : > { %930 = vmatprep.subr.mxu0 %v219_v2  ;;  %938 = vmatprep.mubr.msk.f32.mxu0 %vm228_vm0, %v224_v4  ;;  %v216_v7 = vld [vmem:[%s1522_s1] sm:$0xff]  ;;  %v225_v8 = vld [vmem:[%s1320_s22 + $0x8] sm:$0xff]  ;;  %v227_v11 = vld [vmem:[%s1320_s22 + $0x18] sm:$0xff]  ;;  %v1157_v14 = vmov 0.0   ;;  %s1158_s6 = smov 11   ;;  %s1159_s7 = smov 22  }
  0x38   : > { %931 = vmatpush3.msra.mxu0 %v219_v2  ;;  %503 = vperm.xlu0 %1038, %v1340_v6   ;;  %v226_v9 = vld [vmem:[%s1320_s22 + $0x10] sm:$0xff]  ;;  %222 = vst [vmem:[#allocation2] sm:$0xff] %v1157_v14  ;;  %s1160_s9 = smov 33   ;;  %s1161_s14 = smov 44   ;;  %v1166_v47 = vmov 7   ;;  %v1167_v48 = vmov 6  }
  0x39   : > { %932 = vmatprep.subr.mxu0 %v218_v3  ;;  %519 = vperm.xlu1 %1039, %v1340_v6   ;;  %s1162_s20 = smov 55   ;;  %s1163_s22 = smov 66   ;;  %v1168_v49 = vmov 10   ;;  %v1169_v50 = vmov 8   ;;  %v1170_v51 = vmov 13   ;;  %v1171_v52 = vmov 9  }
  0x3a   : > { %933 = vmatpush3.msra.mxu0 %v218_v3  ;;  %944 = vmatprep.subr.mxu1 %v1157_v14  ;;  %s1164_s8 = smov 77   ;;  %s1165_s10 = smov 88   ;;  %v1172_v53 = vmov 0   ;;  %v1173_v54 = vmov 11   ;;  %v1174_v55 = vmov 15   ;;  %v1175_v56 = vmov 12  }
  0x3b   : > { %934 = vmatprep.subr.mxu0 %v217_v5  ;;  %v1176_v57 = vmov 14   ;;  %s1177_s11 = smov 127   ;;  %s1178_s12 = smov 126   ;;  %vm330_vm1 = vcmask 172120   ;;  %vm336_vm2 = vcmask 262320   ;;  %vm342_vm3 = vcmask 352520  }
  0x3c   : > { %935 = vmatpush3.msra.mxu0 %v217_v5  ;;  %1041 = vset.pattern.permute.xlu0 %v1155_v12  ;;  %s1179_s26 = smov 125   ;;  %vm348_vm4 = vcmask 442720   ;;  %vm354_vm5 = vcmask 532920   ;;  %vm360_vm6 = vcmask 623120   ;;  %vm366_vm7 = vcmask 713320   ;;  %s1180_s23 = smov 117  }
  0x3d   : > { %936 = vmatprep.subr.mxu0 %v216_v7  ;;  %1040 = vset.pattern.permute.xlu1 %v1154_v10  ;;  %vm372_vm8 = vcmask 803520   ;;  %s1181_s25 = smov 116   ;;  %s1182_s29 = smov 115   ;;  %vm1190_vm9 = vmmov 0   ;;  %vm514_vm10 = vcmask 1039360   ;;  %vm530_vm11 = vcmask 1031168  }
  0x3e   : > { %937 = vmatpush3.msra.mxu0 %v216_v7  ;;  %535 = vperm.xlu1 %1040, %v1340_v6   ;;  %s1183_s30 = smov 114   ;;  %s1184_s5 = smov 106   ;;  %vm546_vm12 = vcmask 1022976   ;;  %vm562_vm13 = vcmask 957440   ;;  %vm578_vm14 = vcmask 949248   ;;  %vm594_vm15 = vcmask 941056  }
  0x3f   : > { %939 = vmatmul.mubr.msk.f32.vlgmr.msra.gmra.mxu0 %vm228_vm0, %v225_v8  ;;  %946 = vmatprep.mubr.msk.f32.mxu1 %vm1190_vm9, %v1157_v14  ;;  %vm742_vm9 = vcmask 64512   ;;  %p1534_p12 = scmp.ne.s32.totalorder %s1530_s27, 0 }
  0x40   : > { %941 = vmatprep.mubr.msk.f32.mxu0 %vm228_vm0, %v226_v9 }
  0x42   : > { %1042 = vset.pattern.permute.xlu1 %v1156_v13 }
  0x43   : > { %942 = vmatmul.mubr.msk.f32.gmra.mxu0 %vm228_vm0, %v227_v11  ;;  %vm610_vm0 = vcmask 932864  }
  0xb3   : > { %v1400_v58 = vpop.permute.xlu0 %503 }
  0xb4   : > { %v1402_v59 = vpop.permute.xlu1 %519  ;;  %v507_v60 = vmul.f32 0.0, %v1400_v58 }
  0xb5   : > { %v523_v61 = vmul.f32 0.0, %v1402_v59 }
  0xb9   : > { %v1408_v62 = vpop.permute.xlu1 %535 }
  0xba   : > { %v539_v63 = vmul.f32 0.0, %v1408_v62 }
  0xff   : > { %v940_v15 = vpop.f32.mrf.mxu0 }
 0x100   : > { %375 = vrot.lane.b32.xlu0 %v940_v15, %s1158_s6  ;;  %v379_v16 = vrot.slane %v940_v15, 1  ;;  %v384_v18 = vrot.slane %v940_v15, 2  ;;  %v389_v20 = vrot.slane %v940_v15, 3  ;;  %v394_v22 = vrot.slane %v940_v15, 4 }
 0x101   : > { %v307_v17 = vpop.f32.mrf.mxu0  ;;  %v399_v24 = vrot.slane %v940_v15, 5  ;;  %v404_v26 = vrot.slane %v940_v15, 6  ;;  %v409_v28 = vrot.slane %v940_v15, 7 }
 0x102   : > { %380 = vrot.lane.b32.xlu1 %v379_v16, %s1159_s7  ;;  %v332_v19 = vrot.slane %v307_v17, 1  ;;  %v338_v21 = vrot.slane %v307_v17, 2  ;;  %v344_v23 = vrot.slane %v307_v17, 3  ;;  %v350_v25 = vrot.slane %v307_v17, 4 }
 0x103   : > { %v356_v27 = vrot.slane %v307_v17, 5  ;;  %v362_v29 = vrot.slane %v307_v17, 6  ;;  %v943_v30 = vpop.f32.mrf.mxu0  ;;  %v368_v31 = vrot.slane %v307_v17, 7 }
 0x104   : > { %327 = vrot.lane.b32.xlu0 %v307_v17, %s1158_s6  ;;  %v459_v34 = vrot.slane %v943_v30, 1  ;;  %v464_v36 = vrot.slane %v943_v30, 2  ;;  %v469_v38 = vrot.slane %v943_v30, 3  ;;  %v474_v40 = vrot.slane %v943_v30, 4 }
 0x105   : > { %v317_v32 = vpop.f32.mrf.mxu0  ;;  %v479_v42 = vrot.slane %v943_v30, 5  ;;  %v484_v44 = vrot.slane %v943_v30, 6  ;;  %v489_v46 = vrot.slane %v943_v30, 7 }
 0x106   : > { %385 = vrot.lane.b32.xlu1 %v384_v18, %s1160_s9  ;;  %v419_v33 = vrot.slane %v317_v32, 1  ;;  %v424_v35 = vrot.slane %v317_v32, 2  ;;  %v429_v37 = vrot.slane %v317_v32, 3  ;;  %v434_v39 = vrot.slane %v317_v32, 4 }
 0x107   : > { %v439_v41 = vrot.slane %v317_v32, 5  ;;  %v444_v43 = vrot.slane %v317_v32, 6  ;;  %v449_v45 = vrot.slane %v317_v32, 7 }
 0x108   : > { %333 = vrot.lane.b32.xlu0 %v332_v19, %s1159_s7 }
 0x10a   : > { %390 = vrot.lane.b32.xlu1 %v389_v20, %s1161_s14 }
 0x10c   : > { %339 = vrot.lane.b32.xlu0 %v338_v21, %s1160_s9 }
 0x10e   : > { %395 = vrot.lane.b32.xlu1 %v394_v22, %s1162_s20 }
 0x110   : > { %345 = vrot.lane.b32.xlu0 %v344_v23, %s1161_s14 }
 0x112   : > { %400 = vrot.lane.b32.xlu1 %v399_v24, %s1163_s22 }
 0x114   : > { %351 = vrot.lane.b32.xlu0 %v350_v25, %s1162_s20 }
 0x116   : > { %405 = vrot.lane.b32.xlu1 %v404_v26, %s1164_s8 }
 0x118   : > { %357 = vrot.lane.b32.xlu0 %v356_v27, %s1163_s22 }
 0x11a   : > { %410 = vrot.lane.b32.xlu1 %v409_v28, %s1165_s10 }
 0x11c   : > { %363 = vrot.lane.b32.xlu0 %v362_v29, %s1164_s8 }
 0x11e   : > { %455 = vrot.lane.b32.xlu1 %v943_v30, %s1158_s6 }
 0x120   : > { %369 = vrot.lane.b32.xlu0 %v368_v31, %s1165_s10 }
 0x122   : > { %415 = vrot.lane.b32.xlu1 %v317_v32, %s1158_s6  ;;  %s1185_s6 = smov 105  }
 0x124   : > { %420 = vrot.lane.b32.xlu0 %v419_v33, %s1159_s7 }
 0x126   : > { %460 = vrot.lane.b32.xlu1 %v459_v34, %s1159_s7  ;;  %s1186_s7 = smov 104  }
 0x128   : > { %425 = vrot.lane.b32.xlu0 %v424_v35, %s1160_s9 }
 0x12a   : > { %465 = vrot.lane.b32.xlu1 %v464_v36, %s1160_s9  ;;  %s1187_s9 = smov 103  }
 0x12c   : > { %430 = vrot.lane.b32.xlu0 %v429_v37, %s1161_s14 }
 0x12e   : > { %470 = vrot.lane.b32.xlu1 %v469_v38, %s1161_s14  ;;  %s1188_s14 = smov 95  }
 0x130   : > { %435 = vrot.lane.b32.xlu0 %v434_v39, %s1162_s20 }
 0x132   : > { %475 = vrot.lane.b32.xlu1 %v474_v40, %s1162_s20  ;;  %s1189_s20 = smov 94  }
 0x134   : > { %440 = vrot.lane.b32.xlu0 %v439_v41, %s1163_s22 }
 0x136   : > { %480 = vrot.lane.b32.xlu1 %v479_v42, %s1163_s22  ;;  %s1191_s22 = smov 93  }
 0x138   : > { %445 = vrot.lane.b32.xlu0 %v444_v43, %s1164_s8 }
 0x13a   : > { %485 = vrot.lane.b32.xlu1 %v484_v44, %s1164_s8  ;;  %s1192_s8 = smov 92  }
 0x13c   : > { %450 = vrot.lane.b32.xlu0 %v449_v45, %s1165_s10 }
 0x13e   : > { %490 = vrot.lane.b32.xlu1 %v489_v46, %s1165_s10 }
 0x140   : > { %551 = vperm.xlu0 %1041, %v1340_v6  }
 0x142   : > { %567 = vperm.xlu1 %1042, %v1340_v6  }
 0x144   : > { %1044 = vset.pattern.permute.xlu0 %v1166_v47 }
 0x145   : > { %599 = vperm.xlu0 %1044, %v1340_v6  }
 0x146   : > { %1043 = vset.pattern.permute.xlu1 %v1167_v48 }
 0x147   : > { %583 = vperm.xlu1 %1043, %v1340_v6  }
 0x149   : > { %1047 = vset.pattern.permute.xlu0 %v1168_v49 }
 0x14a   : > { %647 = vperm.xlu0 %1047, %v1340_v6  }
 0x14b   : > { %1045 = vset.pattern.permute.xlu1 %v1169_v50 }
 0x14c   : > { %615 = vperm.xlu1 %1045, %v1340_v6  }
 0x14e   : > { %1050 = vset.pattern.permute.xlu0 %v1170_v51 }
 0x14f   : > { %695 = vperm.xlu0 %1050, %v1340_v6  }
 0x150   : > { %1046 = vset.pattern.permute.xlu1 %v1171_v52 }
 0x151   : > { %631 = vperm.xlu1 %1046, %v1340_v6  }
 0x153   : > { %1053 = vset.pattern.permute.xlu0 %v1172_v53 }
 0x154   : > { %498 = vperm.xlu0 %1053, %v1340_v6  }
 0x155   : > { %1048 = vset.pattern.permute.xlu1 %v1173_v54 }
 0x156   : > { %663 = vperm.xlu1 %1048, %v1340_v6  }
 0x158   : > { %1054 = vset.pattern.permute.xlu0 %v1174_v55 }
 0x15a   : > { %1049 = vset.pattern.permute.xlu1 %v1175_v56 }
 0x15b   : > { %679 = vperm.xlu1 %1049, %v1340_v6  }
 0x15f   : > { %1051 = vset.pattern.permute.xlu1 %v1176_v57 }
 0x160   : > { %711 = vperm.xlu1 %1051, %v1340_v6  }
 0x164   : > { %1052 = vset.pattern.permute.xlu1 %v1174_v55 }
 0x165   : > { %727 = vperm.xlu1 %1052, %v1340_v6  }
 0x169   : > { %512 = vrot.lane.b32.xlu1 %v507_v60, %s1177_s11 }
 0x16d   : > { %528 = vrot.lane.b32.xlu1 %v523_v61, %s1178_s12 }
 0x171   : > { %544 = vrot.lane.b32.xlu1 %v539_v63, %s1179_s26 }
 0x172   : > { %v376_v0 = vpop.permute.xlu0 %375 }
 0x173   : > { %378 = vst.msk [vmem:[#allocation2 + $0x1] sm:$0x1] %vm330_vm1, %v376_v0 }
 0x174   : > { %v381_v1 = vpop.permute.xlu1 %380 }
 0x175   : > { %383 = vst.msk [vmem:[#allocation2 + $0x1] sm:$0x1] %vm336_vm2, %v381_v1 }
 0x176   : > { %v328_v2 = vpop.permute.xlu0 %327 }
 0x177   : > { %331 = vst.msk [vmem:[#allocation2] sm:$0x1] %vm330_vm1, %v328_v2 }
 0x178   : > { %v386_v3 = vpop.permute.xlu1 %385 }
 0x179   : > { %388 = vst.msk [vmem:[#allocation2 + $0x1] sm:$0x1] %vm342_vm3, %v386_v3 }
 0x17a   : > { %v334_v4 = vpop.permute.xlu0 %333 }
 0x17b   : > { %337 = vst.msk [vmem:[#allocation2] sm:$0x1] %vm336_vm2, %v334_v4 }
 0x17c   : > { %v391_v5 = vpop.permute.xlu1 %390 }
 0x17d   : > { %393 = vst.msk [vmem:[#allocation2 + $0x1] sm:$0x1] %vm348_vm4, %v391_v5 }
 0x17e   : > { %v340_v6 = vpop.permute.xlu0 %339 }
 0x17f   : > { %343 = vst.msk [vmem:[#allocation2] sm:$0x1] %vm342_vm3, %v340_v6 }
 0x180   : > { %v396_v7 = vpop.permute.xlu1 %395 }
 0x181   : > { %398 = vst.msk [vmem:[#allocation2 + $0x1] sm:$0x1] %vm354_vm5, %v396_v7 }
 0x182   : > { %v346_v8 = vpop.permute.xlu0 %345 }
 0x183   : > { %349 = vst.msk [vmem:[#allocation2] sm:$0x1] %vm348_vm4, %v346_v8 }
 0x184   : > { %v401_v9 = vpop.permute.xlu1 %400 }
 0x185   : > { %403 = vst.msk [vmem:[#allocation2 + $0x1] sm:$0x1] %vm360_vm6, %v401_v9 }
 0x186   : > { %v352_v10 = vpop.permute.xlu0 %351 }
 0x187   : > { %355 = vst.msk [vmem:[#allocation2] sm:$0x1] %vm354_vm5, %v352_v10 }
 0x188   : > { %v406_v11 = vpop.permute.xlu1 %405 }
 0x189   : > { %408 = vst.msk [vmem:[#allocation2 + $0x1] sm:$0x1] %vm366_vm7, %v406_v11 }
 0x18a   : > { %v358_v12 = vpop.permute.xlu0 %357 }
 0x18b   : > { %361 = vst.msk [vmem:[#allocation2] sm:$0x1] %vm360_vm6, %v358_v12 }
 0x18c   : > { %v411_v13 = vpop.permute.xlu1 %410 }
 0x18d   : > { %413 = vst.msk [vmem:[#allocation2 + $0x1] sm:$0x1] %vm372_vm8, %v411_v13 }
 0x18e   : > { %v364_v15 = vpop.permute.xlu0 %363 }
 0x18f   : > { %367 = vst.msk [vmem:[#allocation2] sm:$0x1] %vm366_vm7, %v364_v15 }
 0x190   : > { %v456_v16 = vpop.permute.xlu1 %455 }
 0x191   : > { %458 = vst.msk [vmem:[#allocation2 + $0x3] sm:$0x1] %vm330_vm1, %v456_v16 }
 0x192   : > { %v370_v17 = vpop.permute.xlu0 %369 }
 0x193   : > { %373 = vst.msk [vmem:[#allocation2] sm:$0x1] %vm372_vm8, %v370_v17 }
 0x194   : > { %v416_v18 = vpop.permute.xlu1 %415 }
 0x195   : > { %418 = vst.msk [vmem:[#allocation2 + $0x2] sm:$0x1] %vm330_vm1, %v416_v18  ;;  %vm626_vm1 = vcmask 867328  }
 0x196   : > { %v421_v19 = vpop.permute.xlu0 %420 }
 0x197   : > { %423 = vst.msk [vmem:[#allocation2 + $0x2] sm:$0x1] %vm336_vm2, %v421_v19 }
 0x198   : > { %v461_v20 = vpop.permute.xlu1 %460 }
 0x199   : > { %463 = vst.msk [vmem:[#allocation2 + $0x3] sm:$0x1] %vm336_vm2, %v461_v20  ;;  %vm642_vm2 = vcmask 859136  }
 0x19a   : > { %v426_v21 = vpop.permute.xlu0 %425 }
 0x19b   : > { %428 = vst.msk [vmem:[#allocation2 + $0x2] sm:$0x1] %vm342_vm3, %v426_v21 }
 0x19c   : > { %v466_v22 = vpop.permute.xlu1 %465 }
 0x19d   : > { %468 = vst.msk [vmem:[#allocation2 + $0x3] sm:$0x1] %vm342_vm3, %v466_v22  ;;  %vm658_vm3 = vcmask 850944  }
 0x19e   : > { %v431_v23 = vpop.permute.xlu0 %430 }
 0x19f   : > { %433 = vst.msk [vmem:[#allocation2 + $0x2] sm:$0x1] %vm348_vm4, %v431_v23 }
 0x1a0   : > { %v471_v24 = vpop.permute.xlu1 %470 }
 0x1a1   : > { %473 = vst.msk [vmem:[#allocation2 + $0x3] sm:$0x1] %vm348_vm4, %v471_v24  ;;  %vm674_vm4 = vcmask 842752  }
 0x1a2   : > { %v436_v25 = vpop.permute.xlu0 %435 }
 0x1a3   : > { %438 = vst.msk [vmem:[#allocation2 + $0x2] sm:$0x1] %vm354_vm5, %v436_v25 }
 0x1a4   : > { %v476_v26 = vpop.permute.xlu1 %475 }
 0x1a5   : > { %478 = vst.msk [vmem:[#allocation2 + $0x3] sm:$0x1] %vm354_vm5, %v476_v26  ;;  %vm690_vm5 = vcmask 777216  }
 0x1a6   : > { %v441_v27 = vpop.permute.xlu0 %440 }
 0x1a7   : > { %443 = vst.msk [vmem:[#allocation2 + $0x2] sm:$0x1] %vm360_vm6, %v441_v27 }
 0x1a8   : > { %v481_v28 = vpop.permute.xlu1 %480 }
 0x1a9   : > { %483 = vst.msk [vmem:[#allocation2 + $0x3] sm:$0x1] %vm360_vm6, %v481_v28  ;;  %vm706_vm6 = vcmask 769024  }
 0x1aa   : > { %v446_v29 = vpop.permute.xlu0 %445 }
 0x1ab   : > { %448 = vst.msk [vmem:[#allocation2 + $0x2] sm:$0x1] %vm366_vm7, %v446_v29 }
 0x1ac   : > { %v486_v30 = vpop.permute.xlu1 %485 }
 0x1ad   : > { %488 = vst.msk [vmem:[#allocation2 + $0x3] sm:$0x1] %vm366_vm7, %v486_v30  ;;  %vm722_vm7 = vcmask 760832  }
 0x1ae   : > { %v451_v31 = vpop.permute.xlu0 %450 }
 0x1af   : > { %453 = vst.msk [vmem:[#allocation2 + $0x2] sm:$0x1] %vm372_vm8, %v451_v31 }
 0x1b0   : > { %v491_v32 = vpop.permute.xlu1 %490 }
 0x1b1   : > { %493 = vst.msk [vmem:[#allocation2 + $0x3] sm:$0x1] %vm372_vm8, %v491_v32  ;;  %vm738_vm8 = vcmask 752640  }
 0x1b8   : > { %v1445_v33 = vld [vmem:[#allocation2] sm:$0xff] }
 0x1b9   : > { %v522_v34 = vmul.f32 %v1402_v59, %v1445_v33  ;;  %v538_v38 = vmul.f32 %v1408_v62, %v1445_v33  ;;  %v506_v50 = vmul.f32 %v1400_v58, %v1445_v33 }
 0x1bb   : > { %526 = vrot.lane.b32.xlu0 %v522_v34, %s1178_s12  ;;  %v552_v35 = vpop.permute.xlu0 %551  ;;  %s909_s12 = sshll.u32 %s1316_s13, 3 }
 0x1bc   : > { %v555_v36 = vmul.f32 0.0, %v552_v35  ;;  %v554_v40 = vmul.f32 %v552_v35, %v1445_v33 }
 0x1bd   : > { %v568_v37 = vpop.permute.xlu1 %567 }
 0x1be   : > { %v571_v39 = vmul.f32 0.0, %v568_v37  ;;  %560 = vrot.lane.b32.xlu1 %v555_v36, %s1180_s23  ;;  %v570_v43 = vmul.f32 %v568_v37, %v1445_v33 }
 0x1bf   : > { %542 = vrot.lane.b32.xlu0 %v538_v38, %s1179_s26  ;;  %s215_s26 = scalar_lea.vmem [#allocation6], %s909_s12 }
 0x1c0   : > { %v600_v44 = vpop.permute.xlu0 %599 }
 0x1c1   : > { %v603_v45 = vmul.f32 0.0, %v600_v44  ;;  %v602_v49 = vmul.f32 %v600_v44, %v1445_v33 }
 0x1c2   : > { %v584_v41 = vpop.permute.xlu1 %583  ;;  %576 = vrot.lane.b32.xlu1 %v571_v39, %s1181_s25 }
 0x1c3   : > { %v587_v42 = vmul.f32 0.0, %v584_v41  ;;  %558 = vrot.lane.b32.xlu0 %v554_v40, %s1180_s23  ;;  %v586_v46 = vmul.f32 %v584_v41, %v1445_v33  ;;  %s831_s23 = sshll.u32 %s215_s26, 4  ;;  %s1475_s23 = int_to_ptr.vmem [resolvable:$true] %s831_s23 }
 0x1c5   : > { %v648_v54 = vpop.permute.xlu0 %647 }
 0x1c6   : > { %592 = vrot.lane.b32.xlu1 %v587_v42, %s1182_s29  ;;  %v651_v56 = vmul.f32 0.0, %v648_v54  ;;  %v650_v59 = vmul.f32 %v648_v54, %v1445_v33 }
 0x1c7   : > { %574 = vrot.lane.b32.xlu0 %v570_v43, %s1181_s25  ;;  %v616_v47 = vpop.permute.xlu1 %615  ;;  %s916_s25 = sshll.u32 %s1240_s19, 7  ;;  %s1193_s19 = smov [#allocation6]  }
 0x1c8   : > { %v619_v48 = vmul.f32 0.0, %v616_v47  ;;  %v618_v51 = vmul.f32 %v616_v47, %v1445_v33 }
 0x1ca   : > { %608 = vrot.lane.b32.xlu1 %v603_v45, %s1183_s30  ;;  %v696_v63 = vpop.permute.xlu0 %695 }
 0x1cb   : > { %590 = vrot.lane.b32.xlu0 %v586_v46, %s1182_s29  ;;  %v699_v1 = vmul.f32 0.0, %v696_v63  ;;  %v698_v3 = vmul.f32 %v696_v63, %v1445_v33 }
 0x1cc   : > { %v632_v52 = vpop.permute.xlu1 %631 }
 0x1cd   : > { %v635_v53 = vmul.f32 0.0, %v632_v52  ;;  %v634_v55 = vmul.f32 %v632_v52, %v1445_v33 }
 0x1ce   : > { %624 = vrot.lane.b32.xlu1 %v619_v48, %s1184_s5 }
 0x1cf   : > { %606 = vrot.lane.b32.xlu0 %v602_v49, %s1183_s30  ;;  %v499_v11 = vpop.permute.xlu0 %498 }
 0x1d0   : > { %v501_v24 = vmul.f32 %v499_v11, %v1445_v33 }
 0x1d1   : > { %v664_v57 = vpop.permute.xlu1 %663 }
 0x1d2   : > { %510 = vrot.lane.b32.xlu1 %v506_v50, %s1177_s11  ;;  %v667_v60 = vmul.f32 0.0, %v664_v57  ;;  %v666_v58 = vmul.f32 %v664_v57, %v1445_v33 }
 0x1d3   : > { %622 = vrot.lane.b32.xlu0 %v618_v51, %s1184_s5  ;;  %s1480_s5 = scalar_lea.hbm %s1525_s4, %s916_s25 }
 0x1d6   : > { %640 = vrot.lane.b32.xlu1 %v635_v53, %s1185_s6  ;;  %v680_v61 = vpop.permute.xlu1 %679 }
 0x1d7   : > { %638 = vrot.lane.b32.xlu0 %v634_v55, %s1185_s6  ;;  %v683_v62 = vmul.f32 0.0, %v680_v61  ;;  %v682_v0 = vmul.f32 %v680_v61, %v1445_v33  ;;  %s818_s6 = scalar_lea.sflag [#allocation5], %s1316_s13 }
 0x1da   : > { %656 = vrot.lane.b32.xlu1 %v651_v56, %s1186_s7 }
 0x1db   : > { %654 = vrot.lane.b32.xlu0 %v650_v59, %s1186_s7  ;;  %v712_v2 = vpop.permute.xlu1 %711  ;;  %s1083_s7 = scalar_lea.vmem %s1475_s23, 128 }
 0x1dc   : > { %v715_v4 = vmul.f32 0.0, %v712_v2  ;;  %v714_v5 = vmul.f32 %v712_v2, %v1445_v33  ;;  %p1084_p11 = scmp.ne.s32.totalorder %s1475_s23, %s1083_s7 }
 0x1de   : > { %672 = vrot.lane.b32.xlu1 %v667_v60, %s1187_s9  ;;  %p1085_p13 = pnand %p1084_p11, %p1534_p12 }
 0x1df   : > { %670 = vrot.lane.b32.xlu0 %v666_v58, %s1187_s9  ;;  %s1087_s9 = sshll.u32 %s1193_s19, 4  ;;  %s1088_s9 = int_to_ptr.vmem [resolvable:$false] %s1087_s9 }
 0x1e0   : > { %v728_v6 = vpop.permute.xlu1 %727  ;;  %p1086_p4 = pneg %p1085_p13  ;;  %p1090_p5 = scmp.lt.s32.totalorder %s1475_s23, %s1088_s9 }
 0x1e1   : > { %v731_v7 = vmul.f32 0.0, %v728_v6  ;;  %v730_v8 = vmul.f32 %v728_v6, %v1445_v33 }
 0x1e2   : > { %688 = vrot.lane.b32.xlu1 %v683_v62, %s1188_s14 }
 0x1e3   : > { %686 = vrot.lane.b32.xlu0 %v682_v0, %s1188_s14  ;;  %s1089_s14 = scalar_lea.vmem %s1088_s9, 256 }
 0x1e4   : > { %v513_v9 = vpop.permute.xlu1 %512  ;;  %p1091_p7 = scmp.lt.s32.totalorder %s1089_s14, %s1083_s7 }
 0x1e6   : > { %704 = vrot.lane.b32.xlu1 %v699_v1, %s1189_s20  ;;  %p1092_p8 = por %p1091_p7, %p1090_p5 }
 0x1e7   : > { %702 = vrot.lane.b32.xlu0 %v698_v3, %s1189_s20 }
 0x1e8   : > { %v529_v10 = vpop.permute.xlu1 %528  ;;  %p1093_p10 = pnand %p1092_p8, %p1086_p4 }
 0x1ea   : > { %720 = vrot.lane.b32.xlu1 %v715_v4, %s1191_s22 }
 0x1eb   : > { %718 = vrot.lane.b32.xlu0 %v714_v5, %s1191_s22 }
 0x1ec   : > { %v545_v12 = vpop.permute.xlu1 %544 }
 0x1ee   : > { %736 = vrot.lane.b32.xlu1 %v731_v7, %s1192_s8  ;;  %v221_v7 = vld [vmem:[%s1524_s3] sm:$0xff] }
 0x1ef   : > { %734 = vrot.lane.b32.xlu0 %v730_v8, %s1192_s8 }
 0x22d   : > { %v527_v13 = vpop.permute.xlu0 %526 }
 0x22e   : > { %v531_v29 = vsel %vm530_vm11, %v527_v13, %v529_v10 }
 0x230   : > { %v561_v15 = vpop.permute.xlu1 %560 }
 0x231   : > { %v543_v14 = vpop.permute.xlu0 %542 }
 0x232   : > { %v547_v32 = vsel %vm546_vm12, %v543_v14, %v545_v12 }
 0x234   : > { %v577_v16 = vpop.permute.xlu1 %576 }
 0x235   : > { %v559_v17 = vpop.permute.xlu0 %558 }
 0x236   : > { %v563_v36 = vsel %vm562_vm13, %v559_v17, %v561_v15 }
 0x238   : > { %v593_v18 = vpop.permute.xlu1 %592 }
 0x239   : > { %v575_v19 = vpop.permute.xlu0 %574 }
 0x23a   : > { %v579_v39 = vsel %vm578_vm14, %v575_v19, %v577_v16 }
 0x23c   : > { %v609_v20 = vpop.permute.xlu1 %608 }
 0x23d   : > { %v591_v21 = vpop.permute.xlu0 %590 }
 0x23e   : > { %v595_v41 = vsel %vm594_vm15, %v591_v21, %v593_v18 }
 0x240   : > { %v625_v22 = vpop.permute.xlu1 %624 }
 0x241   : > { %v607_v23 = vpop.permute.xlu0 %606 }
 0x242   : > { %v611_v44 = vsel %vm610_vm0, %v607_v23, %v609_v20 }
 0x244   : > { %v511_v25 = vpop.permute.xlu1 %510 }
 0x245   : > { %v515_v26 = vsel %vm514_vm10, %v511_v25, %v513_v9  ;;  %v623_v27 = vpop.permute.xlu0 %622 }
 0x246   : > { %v517_v28 = vadd.f32 %v515_v26, %v501_v24  ;;  %v627_v47 = vsel %vm626_vm1, %v623_v27, %v625_v22 }
 0x248   : > { %v533_v30 = vadd.f32 %v531_v29, %v517_v28  ;;  %v641_v31 = vpop.permute.xlu1 %640 }
 0x249   : > { %v639_v34 = vpop.permute.xlu0 %638 }
 0x24a   : > { %v549_v35 = vadd.f32 %v547_v32, %v533_v30  ;;  %v643_v50 = vsel %vm642_vm2, %v639_v34, %v641_v31 }
 0x24c   : > { %v565_v37 = vadd.f32 %v563_v36, %v549_v35  ;;  %v657_v38 = vpop.permute.xlu1 %656 }
 0x24d   : > { %v655_v33 = vpop.permute.xlu0 %654 }
 0x24e   : > { %v581_v40 = vadd.f32 %v579_v39, %v565_v37  ;;  %v659_v53 = vsel %vm658_vm3, %v655_v33, %v657_v38 }
 0x250   : > { %v597_v42 = vadd.f32 %v595_v41, %v581_v40  ;;  %v673_v43 = vpop.permute.xlu1 %672 }
 0x251   : > { %v671_v45 = vpop.permute.xlu0 %670 }
 0x252   : > { %v613_v46 = vadd.f32 %v611_v44, %v597_v42  ;;  %v675_v56 = vsel %vm674_vm4, %v671_v45, %v673_v43 }
 0x254   : > { %v629_v48 = vadd.f32 %v627_v47, %v613_v46  ;;  %v689_v49 = vpop.permute.xlu1 %688 }
 0x255   : > { %v687_v51 = vpop.permute.xlu0 %686 }
 0x256   : > { %v645_v52 = vadd.f32 %v643_v50, %v629_v48  ;;  %v691_v60 = vsel %vm690_vm5, %v687_v51, %v689_v49 }
 0x258   : > { %v661_v54 = vadd.f32 %v659_v53, %v645_v52  ;;  %v705_v55 = vpop.permute.xlu1 %704 }
 0x259   : > { %v703_v57 = vpop.permute.xlu0 %702 }
 0x25a   : > { %v677_v59 = vadd.f32 %v675_v56, %v661_v54  ;;  %v707_v62 = vsel %vm706_vm6, %v703_v57, %v705_v55 }
 0x25c   : > { %v693_v58 = vadd.f32 %v691_v60, %v677_v59  ;;  %v721_v61 = vpop.permute.xlu1 %720 }
 0x25d   : > { %v719_v63 = vpop.permute.xlu0 %718 }
 0x25e   : > { %v709_v0 = vadd.f32 %v707_v62, %v693_v58  ;;  %v723_v1 = vsel %vm722_vm7, %v719_v63, %v721_v61 }
 0x260   : > { %v725_v2 = vadd.f32 %v723_v1, %v709_v0  ;;  %v737_v3 = vpop.permute.xlu1 %736 }
 0x261   : > { %v735_v4 = vpop.permute.xlu0 %734 }
 0x262   : > { %v739_v5 = vsel %vm738_vm8, %v735_v4, %v737_v3 }
 0x263   : > { %v741_v6 = vadd.f32 %v739_v5, %v725_v2 }
 0x265   : > { %945 = vmatpush3.msra.mxu1 %v741_v6 }
 0x266   : > { %947 = vmatmul.mubr.msk.f32.vlgmr.msra.gmra.mxu1 %vm742_vm9, %v221_v7 }
 0x326   : > { %v812_v8 = vpop.f32.mrf.mxu1 }
 0x327   : > { %816 = vst [vmem:[%s215_s26] sm:$0xff] %v812_v8 }
 0x328   : > { %v948_v9 = vpop.f32.mrf.mxu1 }
 0x329   : > { %1096 = shalt.err (!%p1093_p10)
}
 0x32a   : > { %s1097_s20 = scalar_lea.hbm %s1480_s5, 128  ;;  %s1101_s8 = scalar_lea.hbm %s1525_s4, 256 }
 0x32b   : > { %p1098_p0 = scmp.ne.s32.totalorder %s1480_s5, %s1097_s20  ;;  %p1102_p1 = scmp.lt.s32.totalorder %s1480_s5, %s1525_s4 }
 0x32c   : > { %p1103_p3 = scmp.lt.s32.totalorder %s1101_s8, %s1097_s20 }
 0x32d   : > { %p1099_p2 = pnand %p1098_p0, %p1534_p12 }
 0x32e   : > { %p1104_p6 = por %p1103_p3, %p1102_p1 }
 0x32f   : > { %p1100_p9 = pneg %p1099_p2 }
 0x331   : > { %p1105_p11 = pnand %p1104_p6, %p1100_p9 }
 0x333   : > { %1108 = shalt.err (!%p1105_p11)
}
 0x334   : > { %951 = dma.vmem_to_hbm [thread:$0]  (%p1534_p12), %s1475_s23, 128, %s1480_s5, %s818_s6  }
 0x335 PF: > { %s843_s12 = sand.u32 1, %s1135_s15   ;;  %p1535_p13 = scmp.ne.s32.totalorder %s1531_s28, 0 }
 0x336   : > { %p1536_p4 = scmp.ge.s32.totalorder %s1147_s18, 2  ;;  %s844_s26 = scalar_lea.sflag [#allocation5], %s843_s12 }
 0x338   : > { %p958_p5 = pnand %p1536_p4, %p1535_p13 }
 0x33a   : > { %p959_p7 = pneg %p958_p5 }
 0x33c   : > { %1130 = dma.done.wait (%p959_p7), %s844_s26, 128  }
 0x33d   : > { %1132 = vsyncadd (%p959_p7), %s844_s26, 4294967168  ;;  %p17_p8 = scmp.ge.s32.totalorder %s1244_s21, 4   ;;  %s1537_s15 = smov %s1139_s16 }
 0x33e   : > { %s1538_s16 = smov %s1143_s17  ;;  %s1539_s17 = smov %s1256_s24 }
 0x33f   : > { %s1540_s18 = smov %s1244_s21  ;;  %19 = sbr.rel (!%p17_p8) target bundleno = 5 (0x5), region = 81 }
 0x344   :  { %849 = vsyncpa [#allocation4], 1 }
 0x345   :  { %851 = vsyncpa [#allocation4 + $0x1], 1 }
 0x346   :  { %852 = vsyncpa [#allocation5], 1 }
 0x347   :  { %854 = vsyncpa [#allocation5 + $0x1], 1 }

</bundles_post_ra>
